<compile_context>
chip_gen: v7x
topology: tpu7x:2x2x1
jax: 0.10.0
libtpu: 0.0.40
codegen_flags: <defaults>
</compile_context>

<pallas_src>
import jax
import jax.numpy as jnp
from jax.experimental import pallas as pl
from jax.experimental.pallas import tpu as pltpu

INPUT_DIM = 60
HIDDEN1 = 60
HIDDEN2 = 60
HIDDEN3 = 70
OUTPUT_DIM = 3

DEFAULT_TILE_B = 8192      # per review: sweep 4096-8192; footprint stays well under VMEM
VMEM_LIMIT_BYTES = 32 << 20  # v5e default scoped VMEM is only 16 MiB; bump for big tiles


def _round_up(x, m):
    return ((x + m - 1) // m) * m


def _tdnn_kernel(x_ref,
                 w1_ref, b1_ref,
                 w2_ref, b2_ref,
                 w3_ref, b3_ref,
                 w4_ref, b4_ref,
                 o_ref):
    bf16 = jnp.bfloat16
    x = x_ref[...]
    if x.dtype != bf16:            # static dtype check; no-op when the caller already feeds bf16
        x = x.astype(bf16)

    # Layers 1-3: Linear + fused bias/ReLU/cast -> bf16 intermediates (half the VMEM bytes).
    h = jnp.maximum(
        jnp.dot(x, w1_ref[...], preferred_element_type=jnp.float32) + b1_ref[...], 0.0
    ).astype(bf16)
    h = jnp.maximum(
        jnp.dot(h, w2_ref[...], preferred_element_type=jnp.float32) + b2_ref[...], 0.0
    ).astype(bf16)
    h = jnp.maximum(
        jnp.dot(h, w3_ref[...], preferred_element_type=jnp.float32) + b3_ref[...], 0.0
    ).astype(bf16)

    # Output layer: Linear(70 -> 3), no activation; stays f32 / width 3 in HBM.
    o_ref[...] = (jnp.dot(h, w4_ref[...], preferred_element_type=jnp.float32)
                  + b4_ref[...]).astype(o_ref.dtype)


def tdnn_forward(x, params, tile_b=DEFAULT_TILE_B):
    """x: (B, INPUT_DIM) float32 or bfloat16. params: transposed (in, out) weights / (1, out) biases."""
    B = x.shape[0]

    # Batch tile: at most tile_b, at least 8 (sublane multiple), and capped at ceil(B/2)
    # (rounded up to 8) so v7x's two TensorCores each get at least one tile when B > 8.
    half_b = _round_up(max(pl.cdiv(B, 2), 8), 8)
    tb = max(8, min(tile_b, half_b))
    b_pad = _round_up(B, tb)
    if b_pad != B:
        x = jnp.pad(x, ((0, b_pad - B), (0, 0)))

    grid = (pl.cdiv(b_pad, tb),)

    bf16 = jnp.bfloat16
    args = (
        x,
        params["w1"].astype(bf16), params["b1"],
        params["w2"].astype(bf16), params["b2"],
        params["w3"].astype(bf16), params["b3"],
        params["w4"].astype(bf16), params["b4"],
    )

    def resident(shape):
        # Constant block index -> Pallas skips re-DMA; weights stay resident in VMEM.
        return pl.BlockSpec(shape, lambda i: (0, 0))

    in_specs = [
        pl.BlockSpec((tb, INPUT_DIM), lambda i: (i, 0)),             # x: streamed per batch tile
        resident((INPUT_DIM, HIDDEN1)), resident((1, HIDDEN1)),      # w1, b1
        resident((HIDDEN1, HIDDEN2)), resident((1, HIDDEN2)),        # w2, b2
        resident((HIDDEN2, HIDDEN3)), resident((1, HIDDEN3)),        # w3, b3
        resident((HIDDEN3, OUTPUT_DIM)), resident((1, OUTPUT_DIM)),  # w4, b4
    ]
    out_specs = pl.BlockSpec((tb, OUTPUT_DIM), lambda i: (i, 0))

    out = pl.pallas_call(
        _tdnn_kernel,
        out_shape=jax.ShapeDtypeStruct((b_pad, OUTPUT_DIM), jnp.float32),
        grid=grid,
        in_specs=in_specs,
        out_specs=out_specs,
        compiler_params=pltpu.CompilerParams(
            dimension_semantics=("parallel",),       # megacore sharding on v7x, no-op elsewhere
            vmem_limit_bytes=VMEM_LIMIT_BYTES,       # keep big tiles viable on v5e (16 MiB default)
        ),
    )(*args)

    return out[:B]


def init_params(key):
    """PyTorch nn.Linear default init: U(-1/sqrt(fan_in), 1/sqrt(fan_in)).
    Weights stored transposed (in, out); biases (1, out)."""
    dims = [(INPUT_DIM, HIDDEN1), (HIDDEN1, HIDDEN2), (HIDDEN2, HIDDEN3), (HIDDEN3, OUTPUT_DIM)]
    params = {}
    for idx, (fan_in, fan_out) in enumerate(dims, start=1):
        key, kw, kb = jax.random.split(key, 3)
        bound = 1.0 / jnp.sqrt(jnp.float32(fan_in))
        params[f"w{idx}"] = jax.random.uniform(
            kw, (fan_in, fan_out), jnp.float32, -bound, bound)
        params[f"b{idx}"] = jax.random.uniform(
            kb, (1, fan_out), jnp.float32, -bound, bound)
    return params


def tdnn_reference_bf16(x, params):
    """Reference mirroring the kernel numerics: bf16 matmul operands, f32 accumulate/epilogue."""
    bf16 = jnp.bfloat16

    def layer(h, w, b, act):
        y = jnp.dot(h.astype(bf16), w.astype(bf16), preferred_element_type=jnp.float32) + b
        return jnp.maximum(y, 0.0) if act else y

    h = layer(x, params["w1"], params["b1"], True)
    h = layer(h, params["w2"], params["b2"], True)
    h = layer(h, params["w3"], params["b3"], True)
    return layer(h, params["w4"], params["b4"], False)


def tdnn_reference_f32(x, params):
    x = x.astype(jnp.float32)
    h = jnp.maximum(x @ params["w1"] + params["b1"], 0.0)
    h = jnp.maximum(h @ params["w2"] + params["b2"], 0.0)
    h = jnp.maximum(h @ params["w3"] + params["b3"], 0.0)
    return h @ params["w4"] + params["b4"]


if __name__ == "__main__":
    key = jax.random.PRNGKey(0)
    key, kx = jax.random.split(key)
    params = init_params(key)

    # Small primary check (single grid step).
    batch = 8
    x = jax.random.normal(kx, (batch, INPUT_DIM), dtype=jnp.float32)
    out = jax.block_until_ready(tdnn_forward(x, params))
    assert out.shape == (batch, OUTPUT_DIM), out.shape

    ref_bf16 = tdnn_reference_bf16(x, params)
    ref_f32 = tdnn_reference_f32(x, params)
    assert jnp.allclose(out, ref_bf16, atol=2e-3, rtol=2e-3), "mismatch vs bf16-emulated reference"
    assert jnp.allclose(out, ref_f32, atol=5e-2, rtol=5e-2), "mismatch vs f32 reference"

    # Multi-tile grid path: non-multiple batch exercises padding + the >=2-tile (v7x) cap.
    key, kx2 = jax.random.split(key)
    batch2 = 2048 + 13
    x2 = jax.random.normal(kx2, (batch2, INPUT_DIM), dtype=jnp.float32)
    out2 = jax.block_until_ready(tdnn_forward(x2, params, tile_b=1024))
    assert out2.shape == (batch2, OUTPUT_DIM), out2.shape
    assert jnp.allclose(out2, tdnn_reference_bf16(x2, params), atol=2e-3, rtol=2e-3), \
        "mismatch vs bf16-emulated reference (tiled path)"

    # bf16-input path (halves the dominant HBM read; same kernel, no wrapper cast pass).
    x3 = x2.astype(jnp.bfloat16)
    out3 = jax.block_until_ready(tdnn_forward(x3, params, tile_b=1024))
    assert out3.shape == (batch2, OUTPUT_DIM), out3.shape
    assert jnp.allclose(out3, tdnn_reference_bf16(x3, params), atol=2e-3, rtol=2e-3), \
        "mismatch vs bf16-emulated reference (bf16 input path)"

    print("KERNEL_OK")
</pallas_src>

<mosaic_0001>
module attributes {stable_mosaic.version = 11 : i64} {
  func.func @_tdnn_kernel(%arg0: i32, %arg1: memref<8x60xf32, #tpu.memory_space<vmem>>, %arg2: memref<60x60xbf16, #tpu.memory_space<vmem>>, %arg3: memref<1x60xf32, #tpu.memory_space<vmem>>, %arg4: memref<60x60xbf16, #tpu.memory_space<vmem>>, %arg5: memref<1x60xf32, #tpu.memory_space<vmem>>, %arg6: memref<60x70xbf16, #tpu.memory_space<vmem>>, %arg7: memref<1x70xf32, #tpu.memory_space<vmem>>, %arg8: memref<70x3xbf16, #tpu.memory_space<vmem>>, %arg9: memref<1x3xf32, #tpu.memory_space<vmem>>, %arg10: memref<8x3xf32, #tpu.memory_space<vmem>>) attributes {dimension_semantics = [#tpu.dimension_semantics<parallel>], iteration_bounds = array<i64: 1>, scalar_prefetch = 0 : i64, scratch_operands = 0 : i64, tpu.core_type = #tpu.core_type<tc>, window_params = [{transform_indices = @transform_0, window_bounds = array<i64: 8, 60>}, {pipeline_mode = #tpu.pipeline_mode<synchronous>, transform_indices = @transform_1, window_bounds = array<i64: 60, 60>}, {pipeline_mode = #tpu.pipeline_mode<synchronous>, transform_indices = @transform_2, window_bounds = array<i64: 1, 60>}, {pipeline_mode = #tpu.pipeline_mode<synchronous>, transform_indices = @transform_3, window_bounds = array<i64: 60, 60>}, {pipeline_mode = #tpu.pipeline_mode<synchronous>, transform_indices = @transform_4, window_bounds = array<i64: 1, 60>}, {pipeline_mode = #tpu.pipeline_mode<synchronous>, transform_indices = @transform_5, window_bounds = array<i64: 60, 70>}, {pipeline_mode = #tpu.pipeline_mode<synchronous>, transform_indices = @transform_6, window_bounds = array<i64: 1, 70>}, {pipeline_mode = #tpu.pipeline_mode<synchronous>, transform_indices = @transform_7, window_bounds = array<i64: 70, 3>}, {pipeline_mode = #tpu.pipeline_mode<synchronous>, transform_indices = @transform_8, window_bounds = array<i64: 1, 3>}, {transform_indices = @transform_9, window_bounds = array<i64: 8, 3>}]} {
    %c0 = arith.constant 0 : index
    %c0_0 = arith.constant 0 : index
    %0 = vector.load %arg1[%c0, %c0_0] : memref<8x60xf32, #tpu.memory_space<vmem>>, vector<8x60xf32>
    %1 = arith.truncf %0 : vector<8x60xf32> to vector<8x60xbf16>
    %c0_1 = arith.constant 0 : index
    %c0_2 = arith.constant 0 : index
    %2 = vector.load %arg2[%c0_1, %c0_2] : memref<60x60xbf16, #tpu.memory_space<vmem>>, vector<60x60xbf16>
    %cst = arith.constant dense<0.000000e+00> : vector<8x60xf32>
    %3 = tpu.matmul %1, %2, %cst {dimension_numbers = #tpu.dot_dimension_numbers<[1], [0], [0], [1], [0, 0, 1, 1], [], []>} : vector<8x60xbf16>, vector<60x60xbf16>, vector<8x60xf32> -> vector<8x60xf32>
    %c0_3 = arith.constant 0 : index
    %c0_4 = arith.constant 0 : index
    %4 = vector.load %arg3[%c0_3, %c0_4] : memref<1x60xf32, #tpu.memory_space<vmem>>, vector<1x60xf32>
    %5 = vector.broadcast %4 : vector<1x60xf32> to vector<8x60xf32>
    %6 = arith.addf %3, %5 : vector<8x60xf32>
    %cst_5 = arith.constant 0.000000e+00 : f32
    %7 = vector.broadcast %cst_5 : f32 to vector<8x60xf32>
    %8 = arith.maximumf %6, %7 : vector<8x60xf32>
    %9 = arith.truncf %8 : vector<8x60xf32> to vector<8x60xbf16>
    %c0_6 = arith.constant 0 : index
    %c0_7 = arith.constant 0 : index
    %10 = vector.load %arg4[%c0_6, %c0_7] : memref<60x60xbf16, #tpu.memory_space<vmem>>, vector<60x60xbf16>
    %cst_8 = arith.constant dense<0.000000e+00> : vector<8x60xf32>
    %11 = tpu.matmul %9, %10, %cst_8 {dimension_numbers = #tpu.dot_dimension_numbers<[1], [0], [0], [1], [0, 0, 1, 1], [], []>} : vector<8x60xbf16>, vector<60x60xbf16>, vector<8x60xf32> -> vector<8x60xf32>
    %c0_9 = arith.constant 0 : index
    %c0_10 = arith.constant 0 : index
    %12 = vector.load %arg5[%c0_9, %c0_10] : memref<1x60xf32, #tpu.memory_space<vmem>>, vector<1x60xf32>
    %13 = vector.broadcast %12 : vector<1x60xf32> to vector<8x60xf32>
    %14 = arith.addf %11, %13 : vector<8x60xf32>
    %cst_11 = arith.constant 0.000000e+00 : f32
    %15 = vector.broadcast %cst_11 : f32 to vector<8x60xf32>
    %16 = arith.maximumf %14, %15 : vector<8x60xf32>
    %17 = arith.truncf %16 : vector<8x60xf32> to vector<8x60xbf16>
    %c0_12 = arith.constant 0 : index
    %c0_13 = arith.constant 0 : index
    %18 = vector.load %arg6[%c0_12, %c0_13] : memref<60x70xbf16, #tpu.memory_space<vmem>>, vector<60x70xbf16>
    %cst_14 = arith.constant dense<0.000000e+00> : vector<8x70xf32>
    %19 = tpu.matmul %17, %18, %cst_14 {dimension_numbers = #tpu.dot_dimension_numbers<[1], [0], [0], [1], [0, 0, 1, 1], [], []>} : vector<8x60xbf16>, vector<60x70xbf16>, vector<8x70xf32> -> vector<8x70xf32>
    %c0_15 = arith.constant 0 : index
    %c0_16 = arith.constant 0 : index
    %20 = vector.load %arg7[%c0_15, %c0_16] : memref<1x70xf32, #tpu.memory_space<vmem>>, vector<1x70xf32>
    %21 = vector.broadcast %20 : vector<1x70xf32> to vector<8x70xf32>
    %22 = arith.addf %19, %21 : vector<8x70xf32>
    %cst_17 = arith.constant 0.000000e+00 : f32
    %23 = vector.broadcast %cst_17 : f32 to vector<8x70xf32>
    %24 = arith.maximumf %22, %23 : vector<8x70xf32>
    %25 = arith.truncf %24 : vector<8x70xf32> to vector<8x70xbf16>
    %c0_18 = arith.constant 0 : index
    %c0_19 = arith.constant 0 : index
    %26 = vector.load %arg8[%c0_18, %c0_19] : memref<70x3xbf16, #tpu.memory_space<vmem>>, vector<70x3xbf16>
    %cst_20 = arith.constant dense<0.000000e+00> : vector<8x3xf32>
    %27 = tpu.matmul %25, %26, %cst_20 {dimension_numbers = #tpu.dot_dimension_numbers<[1], [0], [0], [1], [0, 0, 1, 1], [], []>} : vector<8x70xbf16>, vector<70x3xbf16>, vector<8x3xf32> -> vector<8x3xf32>
    %c0_21 = arith.constant 0 : index
    %c0_22 = arith.constant 0 : index
    %28 = vector.load %arg9[%c0_21, %c0_22] : memref<1x3xf32, #tpu.memory_space<vmem>>, vector<1x3xf32>
    %29 = vector.broadcast %28 : vector<1x3xf32> to vector<8x3xf32>
    %30 = arith.addf %27, %29 : vector<8x3xf32>
    %c0_23 = arith.constant 0 : index
    %c0_24 = arith.constant 0 : index
    %31 = vector.load %arg10[%c0_23, %c0_24] : memref<8x3xf32, #tpu.memory_space<vmem>>, vector<8x3xf32>
    tpu.vector_store %arg10[%c0_23, %c0_24], %30 {strides = array<i32>} : memref<8x3xf32, #tpu.memory_space<vmem>>, vector<8x3xf32>,
    return
  }
  func.func @transform_0(%arg0: i32) -> (i32, i32) {
    %c0_i32 = arith.constant 0 : i32
    %c0_i32_0 = arith.constant 0 : i32
    return %arg0, %c0_i32 : i32, i32
  }
  func.func @transform_1(%arg0: i32) -> (i32, i32) {
    %c0_i32 = arith.constant 0 : i32
    %c0_i32_0 = arith.constant 0 : i32
    %c0_i32_1 = arith.constant 0 : i32
    return %c0_i32, %c0_i32_0 : i32, i32
  }
  func.func @transform_2(%arg0: i32) -> (i32, i32) {
    %c0_i32 = arith.constant 0 : i32
    %c0_i32_0 = arith.constant 0 : i32
    %c0_i32_1 = arith.constant 0 : i32
    return %c0_i32, %c0_i32_0 : i32, i32
  }
  func.func @transform_3(%arg0: i32) -> (i32, i32) {
    %c0_i32 = arith.constant 0 : i32
    %c0_i32_0 = arith.constant 0 : i32
    %c0_i32_1 = arith.constant 0 : i32
    return %c0_i32, %c0_i32_0 : i32, i32
  }
  func.func @transform_4(%arg0: i32) -> (i32, i32) {
    %c0_i32 = arith.constant 0 : i32
    %c0_i32_0 = arith.constant 0 : i32
    %c0_i32_1 = arith.constant 0 : i32
    return %c0_i32, %c0_i32_0 : i32, i32
  }
  func.func @transform_5(%arg0: i32) -> (i32, i32) {
    %c0_i32 = arith.constant 0 : i32
    %c0_i32_0 = arith.constant 0 : i32
    %c0_i32_1 = arith.constant 0 : i32
    return %c0_i32, %c0_i32_0 : i32, i32
  }
  func.func @transform_6(%arg0: i32) -> (i32, i32) {
    %c0_i32 = arith.constant 0 : i32
    %c0_i32_0 = arith.constant 0 : i32
    %c0_i32_1 = arith.constant 0 : i32
    return %c0_i32, %c0_i32_0 : i32, i32
  }
  func.func @transform_7(%arg0: i32) -> (i32, i32) {
    %c0_i32 = arith.constant 0 : i32
    %c0_i32_0 = arith.constant 0 : i32
    %c0_i32_1 = arith.constant 0 : i32
    return %c0_i32, %c0_i32_0 : i32, i32
  }
  func.func @transform_8(%arg0: i32) -> (i32, i32) {
    %c0_i32 = arith.constant 0 : i32
    %c0_i32_0 = arith.constant 0 : i32
    %c0_i32_1 = arith.constant 0 : i32
    return %c0_i32, %c0_i32_0 : i32, i32
  }
  func.func @transform_9(%arg0: i32) -> (i32, i32) {
    %c0_i32 = arith.constant 0 : i32
    %c0_i32_0 = arith.constant 0 : i32
    return %arg0, %c0_i32 : i32, i32
  }
}

</mosaic_0001>

<bundles_post_ra>
// kernel: tpu_custom_call.1
= control target key start
LH: loop header
LB: loop body
LE: loop exit
PB: predicated region body
PF: predicated region fallthrough
CT: control target
= control target key end

     0   :  { %14 = vsyncpa [#allocation3], 0  ;;  %s745_s0 = inlined_call_operand.vmem [shape: f32[8,60], index: 0, kind: input, shape index: {}]   ;;  %s746_s1 = inlined_call_operand.vmem [shape: bf16[60,60], index: 1, kind: input, shape index: {}]   ;;  %s747_s2 = inlined_call_operand.vmem [shape: f32[1,60], index: 2, kind: input, shape index: {}]   ;;  %s748_s3 = inlined_call_operand.hbm [shape: bf16[60,60], index: 3, kind: input, shape index: {}]   ;;  %s749_s4 = inlined_call_operand.vmem [shape: f32[1,60], index: 4, kind: input, shape index: {}]   ;;  %s750_s5 = inlined_call_operand.hbm [shape: bf16[60,70], index: 5, kind: input, shape index: {}]   ;;  %s751_s6 = inlined_call_operand.vmem [shape: f32[1,70], index: 6, kind: input, shape index: {}]   ;;  %s752_s7 = inlined_call_operand.vmem [shape: bf16[70,3], index: 7, kind: input, shape index: {}]   ;;  %s753_s8 = inlined_call_operand.vmem [shape: f32[1,3], index: 8, kind: input, shape index: {}]   ;;  %s754_s9 = inlined_call_operand.vmem [shape: f32[8,3], index: 9, kind: output, shape index: {}]  }
   0x1   :  { %15 = vsyncpa [#allocation5], 0  ;;  %s589_s30 = smov [#allocation2]   ;;  %s541_s13 = scalar_lea.hbm %s748_s3, 512 }
   0x2   :  { %s27_s10 = sshll.u32 %s589_s30, 4  ;;  %p542_p0 = scmp.ne.s32.totalorder %s748_s3, %s541_s13  ;;  %s28_s10 = int_to_ptr.vmem [resolvable:$true] %s27_s10 }
   0x3   :  { %p545_p1 = scmp.lt.u32.totalorder %s541_s13, %s748_s3 }
   0x5   :  { %p547_p2 = pnand %p545_p1, %p542_p0 }
   0x7   :  { %550 = shalt.err (!%p547_p2)
}
   0x8   :  { %s551_s18 = scalar_lea.vmem %s28_s10, 512  ;;  %p556_p4 = scmp.lt.s32.totalorder %s28_s10, %s28_s10 }
   0x9   :  { %p552_p3 = scmp.ne.s32.totalorder %s28_s10, %s551_s18  ;;  %p557_p5 = scmp.lt.s32.totalorder %s551_s18, %s551_s18 }
   0xb   :  { %p558_p6 = por %p557_p5, %p556_p4 }
   0xd   :  { %p559_p7 = pnand %p558_p6, %p552_p3 }
   0xf   :  { %562 = shalt.err (!%p559_p7)
}
  0x10   :  { %s590_s19 = smov 64   ;;  %s591_s20 = smov 4  }
  0x11   :  { %33 = dma.hbm_to_vmem [thread:$0]  %s748_s3, 512, %s28_s10, [#allocation3], %s590_s19, %s590_s19, %s591_s20  }
  0x12   :  { %s592_s23 = smov [#allocation4]   ;;  %s563_s27 = scalar_lea.hbm %s750_s5, 512 }
  0x13   :  { %s41_s24 = sshll.u32 %s592_s23, 4  ;;  %p564_p8 = scmp.ne.s32.totalorder %s750_s5, %s563_s27  ;;  %s42_s24 = int_to_ptr.vmem [resolvable:$true] %s41_s24 }
  0x14   :  { %p567_p9 = scmp.lt.u32.totalorder %s563_s27, %s750_s5 }
  0x16   :  { %p569_p10 = pnand %p567_p9, %p564_p8 }
  0x18   :  { %572 = shalt.err (!%p569_p10)
}
  0x19   :  { %s573_s12 = scalar_lea.vmem %s42_s24, 512  ;;  %p578_p12 = scmp.lt.s32.totalorder %s42_s24, %s42_s24 }
  0x1a   :  { %p574_p11 = scmp.ne.s32.totalorder %s42_s24, %s573_s12  ;;  %p579_p13 = scmp.lt.s32.totalorder %s573_s12, %s573_s12 }
  0x1c   :  { %p580_p0 = por %p579_p13, %p578_p12 }
  0x1e   :  { %p581_p1 = pnand %p580_p0, %p574_p11 }
  0x20   :  { %584 = shalt.err (!%p581_p1)
}
  0x21   :  { %47 = dma.hbm_to_vmem [thread:$0]  %s750_s5, 512, %s42_s24, [#allocation5], %s590_s19, %s590_s19, %s591_s20  }
  0x22   :  { %585 = dma.done.wait [#allocation3], 512  }
  0x23   :  { %586 = vsyncadd [#allocation3], 4294966784 }
  0x24   :  { %587 = dma.done.wait [#allocation5], 512  }
  0x25   :  { %588 = vsyncadd [#allocation5], 4294966784  ;;  %v593_v0 = vmov 0.0   ;;  %vm594_vm0 = vmmov 0   ;;  %v524_v1 = vld [vmem:[%s746_s1] sm:$0xff]   ;;  %v525_v2 = vld [vmem:[%s746_s1 + $0x8] sm:$0xff]  }
  0x26   :  { %468 = vmatprep.subr.bf16.mxu0 %v593_v0  ;;  %476 = vmatprep.mubr.msk.bf16.mxu0 %vm594_vm0, %v593_v0  ;;  %vm105_vm1 = vcmask 1045504   ;;  %v527_v3 = vld [vmem:[%s746_s1 + $0x18] sm:$0x3f]   ;;  %v528_v4 = vld [vmem:[#allocation2] sm:$0xff]   ;;  %v526_v5 = vld [vmem:[%s746_s1 + $0x10] sm:$0xff]   ;;  %vm101_vm2 = vcmask 490496  }
  0x27   :  { %480 = vmatprep.subr.bf16.mxu1 %v593_v0  ;;  %488 = vmatprep.mubr.msk.bf16.mxu1 %vm594_vm0, %v593_v0  ;;  %v107_v6 = vsel %vm105_vm1, %v527_v3, 0  ;;  %v529_v7 = vld [vmem:[#allocation2 + $0x8] sm:$0xff]   ;;  %v61_v8 = vld [vmem:[%s745_s0] sm:$0xff]  ;;  %v530_v10 = vld [vmem:[#allocation2 + $0x10] sm:$0xff]   ;;  %vm370_vm3 = vcmask 1042432   ;;  %vm366_vm4 = vcmask 572416  }
  0x28   :  { %469 = vmatpush3.bf16.msra.mxu0 %v524_v1  ;;  %481 = vmatpush3.bf16.msra.mxu1 %v528_v4  ;;  %v62_v9 = vpack.c.bf16 %v61_v8, %v61_v8  ;;  %v531_v11 = vld [vmem:[#allocation2 + $0x18] sm:$0x3f]   ;;  %v532_v13 = vld [vmem:[#allocation4] sm:$0xff]   ;;  %v533_v14 = vld [vmem:[#allocation4 + $0x8] sm:$0xff]   ;;  %vm414_vm5 = vcmask 23552  }
  0x29   :  { %470 = vmatprep.subr.bf16.mxu0 %v593_v0  ;;  %482 = vmatprep.subr.bf16.mxu1 %v593_v0  ;;  %v193_v12 = vsel %vm105_vm1, %v531_v11, 0  ;;  %v422_v15 = vld [vmem:[%s747_s2] ss:$0 sm:$0xff]  ;;  %v534_v23 = vld [vmem:[#allocation4 + $0x10] sm:$0xff]   ;;  %v535_v24 = vld [vmem:[#allocation4 + $0x18] sm:$0x3f]  }
  0x2a   :  { %v279_v25 = vsel %vm105_vm1, %v535_v24, 0  ;;  %v536_v26 = vld [vmem:[%s752_s7] sm:$0xff]   ;;  %v537_v27 = vld [vmem:[%s752_s7 + $0x8] sm:$0xff]   ;;  %v538_v28 = vld [vmem:[%s752_s7 + $0x10] sm:$0xff]  }
  0x2b   :  { %v428_v29 = vld [vmem:[%s749_s4] ss:$0 sm:$0xff]  ;;  %v539_v37 = vld [vmem:[%s752_s7 + $0x18] sm:$0xff]  }
  0x2c   :  { %471 = vmatpush3.bf16.msra.mxu0 %v525_v2  ;;  %483 = vmatpush3.bf16.msra.mxu1 %v529_v7  ;;  %v540_v38 = vld [vmem:[%s752_s7 + $0x20] ss:$0 sps:$4 sm:$0x77]  }
  0x2d   :  { %472 = vmatprep.subr.bf16.mxu0 %v593_v0  ;;  %484 = vmatprep.subr.bf16.mxu1 %v593_v0  ;;  %v372_v39 = vsel %vm370_vm3, %v540_v38, 0  ;;  %v434_v40 = vld [vmem:[%s751_s6] ss:$0 sm:$0xff] }
  0x2e   :  { %v440_v48 = vld [vmem:[%s753_s8] ss:$0 sm:$0xff] }
  0x30   :  { %473 = vmatpush3.bf16.msra.mxu0 %v526_v5  ;;  %485 = vmatpush3.bf16.msra.mxu1 %v530_v10 }
  0x31   :  { %474 = vmatprep.subr.bf16.mxu0 %v593_v0  ;;  %486 = vmatprep.subr.bf16.mxu1 %v593_v0 }
  0x34   :  { %475 = vmatpush3.bf16.msra.mxu0 %v107_v6  ;;  %487 = vmatpush3.bf16.msra.mxu1 %v193_v12 }
  0x35   :  { %492 = vmatprep.subr.bf16.mxu0 %v593_v0  ;;  %504 = vmatprep.subr.bf16.mxu1 %v593_v0 }
  0x37   :  { %477 = vmatmul.mubr.msk.bf16.vlgmr.msra.gmra.mrb[0].mxu0 %vm101_vm2, %v62_v9 }
  0x38   :  { %500 = vmatprep.mubr.msk.bf16.mxu0 %vm594_vm0, %v593_v0  ;;  %493 = vmatpush3.bf16.msra.mxu0 %v532_v13 }
  0x39   :  { %494 = vmatprep.subr.bf16.mxu0 %v593_v0 }
  0x3c   :  { %495 = vmatpush3.bf16.msra.mxu0 %v533_v14 }
  0x3d   :  { %496 = vmatprep.subr.bf16.mxu0 %v593_v0 }
  0x40   :  { %497 = vmatpush3.bf16.msra.mxu0 %v534_v23 }
  0x41   :  { %498 = vmatprep.subr.bf16.mxu0 %v593_v0 }
  0x44   :  { %499 = vmatpush3.bf16.msra.mxu0 %v279_v25 }
 0x10a   :  { %v143_v16 = vpop.f32.mrb[0].mxu0 }
 0x10b   :  { %v144_v17 = vadd.f32 %v422_v15, %v143_v16  ;;  %v478_v18 = vpop.f32.mrb[1].mxu0 }
 0x10c   :  { %v146_v19 = vpop.f32.mrb[2].mxu0 }
 0x10d   :  { %v149_v20 = vmax.f32 %v144_v17, 0.0  ;;  %v479_v21 = vpop.f32.mrb[3].mxu0 }
 0x10f   :  { %v150_v22 = vpack.c.bf16 %v149_v20, %v149_v20 }
 0x111   :  { %489 = vmatmul.mubr.msk.bf16.vlgmr.msra.gmra.mrb[0].mxu1 %vm101_vm2, %v150_v22 }
 0x112   :  { %514 = vmatprep.mubr.msk.bf16.mxu1 %vm594_vm0, %v593_v0  ;;  %505 = vmatpush3.bf16.msra.mxu1 %v536_v26 }
 0x113   :  { %506 = vmatprep.subr.bf16.mxu1 %v593_v0 }
 0x116   :  { %507 = vmatpush3.bf16.msra.mxu1 %v537_v27 }
 0x117   :  { %508 = vmatprep.subr.bf16.mxu1 %v593_v0 }
 0x11a   :  { %509 = vmatpush3.bf16.msra.mxu1 %v538_v28 }
 0x11b   :  { %510 = vmatprep.subr.bf16.mxu1 %v593_v0 }
 0x11e   :  { %511 = vmatpush3.bf16.msra.mxu1 %v539_v37 }
 0x11f   :  { %512 = vmatprep.subr.bf16.mxu1 %v593_v0 }
 0x122   :  { %513 = vmatpush3.bf16.msra.mxu1 %v372_v39 }
 0x1e4   :  { %v229_v30 = vpop.f32.mrb[0].mxu1 }
 0x1e5   :  { %v230_v31 = vadd.f32 %v428_v29, %v229_v30  ;;  %v490_v32 = vpop.f32.mrb[1].mxu1 }
 0x1e6   :  { %v232_v33 = vpop.f32.mrb[2].mxu1 }
 0x1e7   :  { %v235_v34 = vmax.f32 %v230_v31, 0.0  ;;  %v491_v35 = vpop.f32.mrb[3].mxu1 }
 0x1e9   :  { %v236_v36 = vpack.c.bf16 %v235_v34, %v235_v34 }
 0x1eb   :  { %501 = vmatmul.mubr.msk.bf16.vlgmr.msra.gmra.mrb[4].mxu0 %vm101_vm2, %v236_v36 }
 0x2be   :  { %v315_v41 = vpop.f32.mrb[4].mxu0 }
 0x2bf   :  { %v316_v42 = vadd.f32 %v434_v40, %v315_v41  ;;  %v502_v43 = vpop.f32.mrb[5].mxu0 }
 0x2c0   :  { %v318_v44 = vpop.f32.mrb[6].mxu0 }
 0x2c1   :  { %v321_v45 = vmax.f32 %v316_v42, 0.0  ;;  %v503_v46 = vpop.f32.mrb[7].mxu0 }
 0x2c3   :  { %v322_v47 = vpack.c.bf16 %v321_v45, %v321_v45 }
 0x2c5   :  { %515 = vmatmul.mubr.msk.bf16.vlgmr.msra.gmra.mrb[4].mxu1 %vm366_vm4, %v322_v47 }
 0x398   :  { %v408_v49 = vpop.f32.mrb[4].mxu1 }
 0x399   :  { %v409_v50 = vadd.f32 %v440_v48, %v408_v49  ;;  %v516_v51 = vpop.f32.mrb[5].mxu1 }
 0x39a   :  { %v411_v52 = vpop.f32.mrb[6].mxu1 }
 0x39b   :  { %415 = vst.msk [vmem:[%s754_s9] sm:$0xff] %vm414_vm5, %v409_v50  ;;  %v517_v53 = vpop.f32.mrb[7].mxu1 }
 0x39c   :  { %420 = vsyncpa [#allocation3], 1 }
 0x39d   :  { %421 = vsyncpa [#allocation5], 1 }

</bundles_post_ra>
